<compile_context>
chip_gen: v5e
topology: v5e:2x2
jax: 0.10.0
libtpu: 0.0.40
codegen_flags: <defaults>
</compile_context>

<pallas_src>
import jax
import jax.numpy as jnp
from jax import lax
from jax.experimental import pallas as pl
from jax.experimental.pallas import tpu as pltpu


def _round_up(x, m):
    return ((x + m - 1) // m) * m


def _cls_head_kernel(x_ref, w1_ref, b1_ref, w2_ref, b2_ref, out_ref):
    # x_ref : [TB, H]   bf16 activation tile
    # w1_ref: [H, H]    dense.weight, torch [out, in] layout, bf16 (resident)
    # b1_ref: [1, H]    dense.bias, f32
    # w2_ref: [Lp, H]   out_proj.weight zero-padded to Lp lanes, bf16 (resident)
    # b2_ref: [1, Lp]   out_proj.bias zero-padded, f32
    # out_ref:[TB, Lp]  f32 logits (lane-dense)
    x = x_ref[...]

    # dense: contract x[:, k] with W1[j, k] -> [TB, H], f32 accumulation on MXU.
    h = lax.dot_general(
        x, w1_ref[...],
        dimension_numbers=(((1,), (1,)), ((), ())),
        preferred_element_type=jnp.float32)
    h = jnp.tanh(h + b1_ref[...])          # bias + tanh in f32 (VPU + EUP)

    # out_proj: contract h[:, k] with W2[j, k] -> [TB, Lp], f32 accumulation.
    o = lax.dot_general(
        h.astype(w2_ref.dtype), w2_ref[...],
        dimension_numbers=(((1,), (1,)), ((), ())),
        preferred_element_type=jnp.float32)
    out_ref[...] = (o + b2_ref[...]).astype(out_ref.dtype)


def roberta_classification_head(features, dense_w, dense_b, out_w, out_b,
                                *, block_b=256):
    """features: [B, H]; dense_w: [H, H] (torch [out, in]); out_w: [L, H]."""
    B, H = features.shape
    L = out_w.shape[0]

    # Lane-pad num_labels to a full 128-lane multiple -> unmasked stores.
    Lp = _round_up(max(L, 128), 128)
    # Batch tile: multiple of 16 (bf16 sublane packing); cap at block_b.
    TB = min(_round_up(block_b, 16), _round_up(B, 16))
    Bp = _round_up(B, TB)

    # Operand prep (bf16 MXU inputs, f32 biases; no weight transpose).
    x = features.astype(jnp.bfloat16)
    if Bp != B:
        x = jnp.pad(x, ((0, Bp - B), (0, 0)))
    w1 = dense_w.astype(jnp.bfloat16)                                # [H, H]
    w2 = jnp.pad(out_w, ((0, Lp - L), (0, 0))).astype(jnp.bfloat16)  # [Lp, H]
    b1 = dense_b.astype(jnp.float32).reshape(1, H)
    b2 = jnp.pad(out_b, (0, Lp - L)).astype(jnp.float32).reshape(1, Lp)

    grid = (Bp // TB,)

    cost = pl.CostEstimate(
        flops=2 * Bp * H * H + 2 * Bp * H * Lp,
        transcendentals=Bp * H,                       # tanh
        bytes_accessed=(x.size * 2 + w1.size * 2 + w2.size * 2
                        + b1.size * 4 + b2.size * 4 + Bp * Lp * 4),
    )

    out_padded = pl.pallas_call(
        _cls_head_kernel,
        out_shape=jax.ShapeDtypeStruct((Bp, Lp), jnp.float32),
        grid_spec=pltpu.PrefetchScalarGridSpec(
            num_scalar_prefetch=0,
            grid=grid,
            in_specs=[
                pl.BlockSpec((TB, H), lambda i: (i, 0)),   # activation tile
                pl.BlockSpec((H, H), lambda i: (0, 0)),    # dense.weight (resident)
                pl.BlockSpec((1, H), lambda i: (0, 0)),    # dense.bias
                pl.BlockSpec((Lp, H), lambda i: (0, 0)),   # out_proj.weight (resident)
                pl.BlockSpec((1, Lp), lambda i: (0, 0)),   # out_proj.bias
            ],
            out_specs=pl.BlockSpec((TB, Lp), lambda i: (i, 0)),
        ),
        compiler_params=pltpu.CompilerParams(
            dimension_semantics=("parallel",),
            vmem_limit_bytes=32 * 1024 * 1024,
        ),
        cost_estimate=cost,
    )(x, w1, b1, w2, b2)

    # Strip batch padding and lane padding; return valid logits.
    return out_padded[:B, :L].astype(features.dtype)


def _reference(features, dense_w, dense_b, out_w, out_b):
    h = jnp.tanh(features @ dense_w.T + dense_b)
    return h @ out_w.T + out_b


if __name__ == "__main__":
    # Small config consistent with the module: hidden_size=32, num_labels=4.
    # batch=32 with block_b=16 exercises a 2-step, batch-parallel grid.
    B, H, L = 32, 32, 4
    key = jax.random.PRNGKey(0)
    k_x, k_w1, k_b1, k_w2, k_b2 = jax.random.split(key, 5)

    features = jax.random.normal(k_x, (B, H), dtype=jnp.float32)
    # Deterministic "initialized" parameters (torch Linear layout: [out, in]).
    dense_w = jax.random.normal(k_w1, (H, H), dtype=jnp.float32) * 0.05
    dense_b = jax.random.normal(k_b1, (H,), dtype=jnp.float32) * 0.05
    out_w = jax.random.normal(k_w2, (L, H), dtype=jnp.float32) * 0.05
    out_b = jax.random.normal(k_b2, (L,), dtype=jnp.float32) * 0.05

    out = roberta_classification_head(features, dense_w, dense_b, out_w, out_b,
                                      block_b=16)
    out = jax.block_until_ready(out)

    ref = _reference(features, dense_w, dense_b, out_w, out_b)
    assert out.shape == (B, L)
    # bf16 MXU operands with f32 accumulation -> loosened tolerance.
    assert jnp.allclose(out, ref, atol=2e-2, rtol=2e-2)

    print("KERNEL_OK")
</pallas_src>

<mosaic_0001>
module attributes {stable_mosaic.version = 11 : i64} {
  func.func @_cls_head_kernel(%arg0: i32, %arg1: memref<16x32xbf16, #tpu.memory_space<vmem>>, %arg2: memref<32x32xbf16, #tpu.memory_space<vmem>>, %arg3: memref<1x32xf32, #tpu.memory_space<vmem>>, %arg4: memref<128x32xbf16, #tpu.memory_space<vmem>>, %arg5: memref<1x128xf32, #tpu.memory_space<vmem>>, %arg6: memref<16x128xf32, #tpu.memory_space<vmem>>) attributes {dimension_semantics = [#tpu.dimension_semantics<parallel>], iteration_bounds = array<i64: 2>, scalar_prefetch = 0 : i64, scratch_operands = 0 : i64, tpu.core_type = #tpu.core_type<tc>, window_params = [{transform_indices = @transform_0, window_bounds = array<i64: 16, 32>}, {pipeline_mode = #tpu.pipeline_mode<synchronous>, transform_indices = @transform_1, window_bounds = array<i64: 32, 32>}, {pipeline_mode = #tpu.pipeline_mode<synchronous>, transform_indices = @transform_2, window_bounds = array<i64: 1, 32>}, {pipeline_mode = #tpu.pipeline_mode<synchronous>, transform_indices = @transform_3, window_bounds = array<i64: 128, 32>}, {pipeline_mode = #tpu.pipeline_mode<synchronous>, transform_indices = @transform_4, window_bounds = array<i64: 1, 128>}, {transform_indices = @transform_5, window_bounds = array<i64: 16, 128>}]} {
    %c0 = arith.constant 0 : index
    %c0_0 = arith.constant 0 : index
    %0 = vector.load %arg1[%c0, %c0_0] : memref<16x32xbf16, #tpu.memory_space<vmem>>, vector<16x32xbf16>
    %c0_1 = arith.constant 0 : index
    %c0_2 = arith.constant 0 : index
    %1 = vector.load %arg2[%c0_1, %c0_2] : memref<32x32xbf16, #tpu.memory_space<vmem>>, vector<32x32xbf16>
    %cst = arith.constant dense<0.000000e+00> : vector<16x32xf32>
    %2 = tpu.matmul %0, %1, %cst {dimension_numbers = #tpu.dot_dimension_numbers<[1], [1], [0], [0], [0, 0, 1, 0], [], []>} : vector<16x32xbf16>, vector<32x32xbf16>, vector<16x32xf32> -> vector<16x32xf32>
    %c0_3 = arith.constant 0 : index
    %c0_4 = arith.constant 0 : index
    %3 = vector.load %arg3[%c0_3, %c0_4] : memref<1x32xf32, #tpu.memory_space<vmem>>, vector<1x32xf32>
    %4 = vector.broadcast %3 : vector<1x32xf32> to vector<16x32xf32>
    %5 = arith.addf %2, %4 : vector<16x32xf32>
    %6 = math.tanh %5 : vector<16x32xf32>
    %7 = arith.truncf %6 : vector<16x32xf32> to vector<16x32xbf16>
    %c0_5 = arith.constant 0 : index
    %c0_6 = arith.constant 0 : index
    %8 = vector.load %arg4[%c0_5, %c0_6] : memref<128x32xbf16, #tpu.memory_space<vmem>>, vector<128x32xbf16>
    %cst_7 = arith.constant dense<0.000000e+00> : vector<16x128xf32>
    %9 = tpu.matmul %7, %8, %cst_7 {dimension_numbers = #tpu.dot_dimension_numbers<[1], [1], [0], [0], [0, 0, 1, 0], [], []>} : vector<16x32xbf16>, vector<128x32xbf16>, vector<16x128xf32> -> vector<16x128xf32>
    %c0_8 = arith.constant 0 : index
    %c0_9 = arith.constant 0 : index
    %10 = vector.load %arg5[%c0_8, %c0_9] : memref<1x128xf32, #tpu.memory_space<vmem>>, vector<1x128xf32>
    %11 = vector.broadcast %10 : vector<1x128xf32> to vector<16x128xf32>
    %12 = arith.addf %9, %11 : vector<16x128xf32>
    %c0_10 = arith.constant 0 : index
    %c0_11 = arith.constant 0 : index
    %13 = vector.load %arg6[%c0_10, %c0_11] : memref<16x128xf32, #tpu.memory_space<vmem>>, vector<16x128xf32>
    tpu.vector_store %arg6[%c0_10, %c0_11], %12 {strides = array<i32>} : memref<16x128xf32, #tpu.memory_space<vmem>>, vector<16x128xf32>,
    return
  }
  func.func @transform_0(%arg0: i32) -> (i32, i32) {
    %c0_i32 = arith.constant 0 : i32
    %c0_i32_0 = arith.constant 0 : i32
    return %arg0, %c0_i32 : i32, i32
  }
  func.func @transform_1(%arg0: i32) -> (i32, i32) {
    %c0_i32 = arith.constant 0 : i32
    %c0_i32_0 = arith.constant 0 : i32
    %c0_i32_1 = arith.constant 0 : i32
    return %c0_i32, %c0_i32_0 : i32, i32
  }
  func.func @transform_2(%arg0: i32) -> (i32, i32) {
    %c0_i32 = arith.constant 0 : i32
    %c0_i32_0 = arith.constant 0 : i32
    %c0_i32_1 = arith.constant 0 : i32
    return %c0_i32, %c0_i32_0 : i32, i32
  }
  func.func @transform_3(%arg0: i32) -> (i32, i32) {
    %c0_i32 = arith.constant 0 : i32
    %c0_i32_0 = arith.constant 0 : i32
    %c0_i32_1 = arith.constant 0 : i32
    return %c0_i32, %c0_i32_0 : i32, i32
  }
  func.func @transform_4(%arg0: i32) -> (i32, i32) {
    %c0_i32 = arith.constant 0 : i32
    %c0_i32_0 = arith.constant 0 : i32
    %c0_i32_1 = arith.constant 0 : i32
    return %c0_i32, %c0_i32_0 : i32, i32
  }
  func.func @transform_5(%arg0: i32) -> (i32, i32) {
    %c0_i32 = arith.constant 0 : i32
    %c0_i32_0 = arith.constant 0 : i32
    return %arg0, %c0_i32 : i32, i32
  }
}

</mosaic_0001>

<bundles_post_ra>
// kernel: tpu_custom_call.1
= control target key start
LH: loop header
LB: loop body
LE: loop exit
PB: predicated region body
PF: predicated region fallthrough
CT: control target
= control target key end

     0   :  { %10 = vsyncpa [#allocation3], 0  ;;  %s805_s0 = inlined_call_operand.vmem [shape: bf16[32,32], index: 0, kind: input, shape index: {}]   ;;  %s806_s1 = inlined_call_operand.vmem [shape: bf16[32,32], index: 1, kind: input, shape index: {}]   ;;  %s807_s2 = inlined_call_operand.vmem [shape: f32[1,32], index: 2, kind: input, shape index: {}]   ;;  %s808_s3 = inlined_call_operand.vmem [shape: bf16[128,32], index: 3, kind: input, shape index: {}]   ;;  %s809_s4 = inlined_call_operand.vmem [shape: f32[1,128], index: 4, kind: input, shape index: {}]   ;;  %s810_s5 = inlined_call_operand.hbm [shape: f32[32,128], index: 5, kind: output, shape index: {}]  }
   0x1   :  { %12 = vsyncpa [#allocation3 + $0x1], 0  ;;  %s673_s18 = smov 0   ;;  %s675_s19 = smov 0  }
   0x2   :  { %s677_s20 = smov 0   ;;  %s679_s21 = smov 0  }
   0x3 LB: > { %s694_s22 = sadd.s32 4294967295, %s639_s21   ;;  %s460_s23 = sadd.s32 4294967294, %s639_s21   ;;  %s639_s21 = sphi %s679_s21, %s816_s21   ;;  %s635_s20 = sphi %s677_s20, %s815_s20   ;;  %s631_s19 = sphi %s675_s19, %s814_s19   ;;  %s627_s18 = sphi %s673_s18, %s813_s18  }
   0x4   : > { %s698_s24 = sadd.s32 1, %s639_s21   ;;  %s135_s25 = sadd.s32 1, %s635_s20 }
   0x5   : > { %s132_s26 = ssub.s32 %s639_s21, %s698_s24  ;;  %p145_p0 = scmp.ne.s32.totalorder %s635_s20, %s631_s19 }
   0x6   : > { %p133_p1 = scmp.eq.s32.totalorder %s132_s26, 0  ;;  %p146_p2 = scmp.eq.s32.totalorder %s694_s22, 1 }
   0x7   : > { %p151_p3 = scmp.ne.s32.totalorder %s631_s19, %s627_s18  ;;  %p152_p4 = scmp.eq.s32.totalorder %s460_s23, 1 }
   0x8   : > { %s709_s27 = scalar_select %p133_p1, %s635_s20, %s135_s25  }
   0x9   : > { %p711_p5 = por %p146_p2, %p145_p0  ;;  %p715_p6 = por %p152_p4, %p151_p3 }
   0xa   : > { %p463_p7 = scmp.ge.s32.totalorder %s639_s21, 1  ;;  %p191_p8 = scmp.lt.s32.totalorder %s639_s21, 3 }
   0xc   : > { %p192_p9 = pnand %p463_p7, %p191_p8 }
   0xd   : > { %s465_s7 = sshll.u32 (!%p192_p9), %s694_s22, 1  ;;  %s216_s16 = sand.u32 (!%p192_p9), 1, %s631_s19  }
   0xe   : > { %195 = sbr.rel (%p192_p9) target bundleno = 321 (0x141), region = 40  ;;  %p220_p10 = scmp.lt.s32.totalorder (!%p192_p9), %s465_s7, 3 }
   0xf   : > { %s529_s26 = sshll.u32 (!%p192_p9), %s694_s22, 4  ;;  %s383_s11 = scalar_lea.sflag (!%p192_p9), [#allocation3], %s216_s16 }
  0x10   : > { %s597_s15 = scalar_lea.hbm (!%p192_p9), %s810_s5, 32 }
  0x13   : > { %v520_v0 = vld [vmem:[%s806_s1 + $0x8] sm:$0xff]  ;;  %vm252_vm0 = vcmask 261120   ;;  %v528_v1 = vld [vmem:[%s808_s3 + $0x38] sm:$0xff]  ;;  %v519_v4 = vld [vmem:[%s806_s1] sm:$0xff]  ;;  %s818_s7 = smov (!%p220_p10, %s465_s7), 3 }
  0x14   : > { %v260_v2 = vsel %vm252_vm0, %v520_v0, 0  ;;  %v364_v3 = vsel %vm252_vm0, %v528_v1, 0  ;;  %v527_v5 = vld [vmem:[%s808_s3 + $0x30] sm:$0xff]  ;;  %v257_v6 = vsel %vm252_vm0, %v519_v4, 0  ;;  %s466_s14 = sshll.u32 %s818_s7, 2  ;;  %v526_v8 = vld [vmem:[%s808_s3 + $0x28] sm:$0xff]  ;;  %s394_s7 = scalar_lea.hbm %s810_s5, %s529_s26 }
  0x15   : > { %268 = vmatpush.bf16.xpose.msra.mxu0 %v260_v2  ;;  %366 = vmatpush.bf16.xpose.msra.mxu1 %v364_v3  ;;  %v361_v7 = vsel %vm252_vm0, %v527_v5, 0  ;;  %s223_s17 = scalar_lea.vmem %s805_s0, %s466_s14  ;;  %v358_v10 = vsel %vm252_vm0, %v526_v8, 0  ;;  %v525_v11 = vld [vmem:[%s808_s3 + $0x20] sm:$0xff]  ;;  %v524_v13 = vld [vmem:[%s808_s3 + $0x18] sm:$0xff]  ;;  %v523_v15 = vld [vmem:[%s808_s3 + $0x10] sm:$0xff]  ;;  %s397_s10 = sshll.u32 %s394_s7, 4  ;;  %s398_s10 = int_to_ptr.hbm [resolvable:$true] %s397_s10 }
  0x16   : > { %v518_v9 = vld [vmem:[%s223_s17] sm:$0xff]  ;;  %v355_v12 = vsel %vm252_vm0, %v525_v11, 0  ;;  %v352_v14 = vsel %vm252_vm0, %v524_v13, 0  ;;  %v349_v16 = vsel %vm252_vm0, %v523_v15, 0  ;;  %v522_v17 = vld [vmem:[%s808_s3 + $0x8] sm:$0xff]  ;;  %s464_s17 = sshll.u32 %s216_s16, 4 }
  0x17   : > { %v346_v18 = vsel %vm252_vm0, %v522_v17, 0  ;;  %v521_v19 = vld [vmem:[%s808_s3] sm:$0xff]  ;;  %s218_s8 = scalar_lea.vmem [#allocation2], %s464_s17  ;;  %s591_s12 = sshra.s32 %s398_s10, 4  ;;  %s592_s12 = int_to_ptr.hbm [resolvable:$true] %s591_s12 }
  0x18   : > { %v343_v20 = vsel %vm252_vm0, %v521_v19, 0  ;;  %v571_v22 = vld [vmem:[%s807_s2] ss:$0 sm:$0xff]  ;;  %s395_s9 = sshll.u32 %s218_s8, 4  ;;  %s593_s22 = scalar_lea.hbm %s592_s12, 16  ;;  %s396_s9 = int_to_ptr.vmem [resolvable:$true] %s395_s9 }
  0x19   : > { %v572_v29 = vld [vmem:[%s809_s4] ss:$0 sm:$0xff]  ;;  %p594_p11 = scmp.ne.s32.totalorder %s592_s12, %s593_s22  ;;  %p598_p0 = scmp.lt.s32.totalorder %s592_s12, %s810_s5 }
  0x1a   : > { %p599_p1 = scmp.lt.s32.totalorder %s597_s15, %s593_s22 }
  0x1b   : > { %p595_p12 = pnand %p594_p11, %p711_p5 }
  0x1c   : > { %p600_p2 = por %p599_p1, %p598_p0 }
  0x1d   : > { %269 = vmatpush.bf16.xpose.msra.mxu0 %v257_v6  ;;  %367 = vmatpush.bf16.xpose.msra.mxu1 %v361_v7  ;;  %p596_p13 = pneg %p595_p12 }
  0x1f   : > { %p601_p3 = pnand %p600_p2, %p596_p13 }
  0x24   : > { %479 = vmatmul.msk.bf16.vlgmr.msra.gmra.mxu0 %vm252_vm0, %v518_v9 }
  0x25   : > { %368 = vmatpush.bf16.xpose.msra.mxu1 %v358_v10 }
  0x2d   : > { %369 = vmatpush.bf16.xpose.msra.mxu1 %v355_v12 }
  0x35   : > { %370 = vmatpush.bf16.xpose.msra.mxu1 %v352_v14 }
  0x3d   : > { %371 = vmatpush.bf16.xpose.msra.mxu1 %v349_v16 }
  0x45   : > { %372 = vmatpush.bf16.xpose.msra.mxu1 %v346_v18 }
  0x4d   : > { %373 = vmatpush.bf16.xpose.msra.mxu1 %v343_v20 }
  0xa1   : > { %v271_v21 = vpop.f32.mrf.mxu0 }
  0xa2   : > { %v272_v23 = vadd.f32 %v571_v22, %v271_v21 }
  0xa4   : > { %573 = vtanh.f32 %v272_v23 }
  0xa9   : > { %v273_v24 = vpop.f32.mrf.mxu0 }
  0xaa   : > { %v274_v25 = vadd.f32 %v571_v22, %v273_v24  ;;  %v574_v26 = vpop.eup %573 }
  0xac   : > { %575 = vtanh.f32 %v274_v25 }
  0xb2   : > { %v576_v27 = vpop.eup %575 }
  0xb3   : > { %v278_v28 = vpack.c.bf16 %v576_v27, %v574_v26 }
  0xb5   : > { %512 = vmatmul.msk.bf16.vlgmr.msra.gmra.mxu1 %vm252_vm0, %v278_v28 }
 0x132   : > { %v375_v30 = vpop.f32.mrf.mxu1 }
 0x133   : > { %v376_v31 = vadd.f32 %v572_v29, %v375_v30 }
 0x135   : > { %380 = vst [vmem:[%s218_s8] sm:$0xff] %v376_v31 }
 0x13a   : > { %v377_v32 = vpop.f32.mrf.mxu1 }
 0x13b   : > { %v378_v33 = vadd.f32 %v572_v29, %v377_v32 }
 0x13d   : > { %381 = vst [vmem:[%s218_s8 + $0x8] sm:$0xff] %v378_v33 }
 0x13e   : > { %604 = shalt.err (!%p601_p3)
}
 0x13f   : > { %s641_s16 = smov 128   ;;  %s642_s25 = smov 8  }
 0x140   : > { %530 = dma.vmem_to_hbm [thread:$0]  (%p711_p5), %s396_s9, 256, %s398_s10, %s383_s11, %s641_s16, %s641_s16, %s642_s25  }
 0x141 PF: > { %p536_p4 = scmp.ge.s32.totalorder %s639_s21, 2  ;;  %s412_s26 = sand.u32 1, %s627_s18  }
 0x142   : > { %s413_s30 = scalar_lea.sflag [#allocation3], %s412_s26 }
 0x143   : > { %p533_p7 = pnand %p536_p4, %p715_p6 }
 0x145   : > { %p534_p8 = pneg %p533_p7 }
 0x147   : > { %622 = dma.done.wait (%p534_p8), %s413_s30, 256  }
 0x148   : > { %624 = vsyncadd (%p534_p8), %s413_s30, 4294967040  ;;  %p15_p9 = scmp.ge.s32.totalorder %s698_s24, 4   ;;  %s813_s18 = smov %s631_s19 }
 0x149   : > { %s814_s19 = smov %s635_s20  ;;  %s815_s20 = smov %s709_s27 }
 0x14a   : > { %s816_s21 = smov %s698_s24  ;;  %17 = sbr.rel (!%p15_p9) target bundleno = 3 (0x3), region = 75 }
 0x14f   :  { %419 = vsyncpa [#allocation3], 1 }
 0x150   :  { %421 = vsyncpa [#allocation3 + $0x1], 1 }

</bundles_post_ra>
